<compile_context>
chip_gen: v7x
topology: tpu7x:2x2x1
jax: 0.10.0
libtpu: 0.0.40
codegen_flags: <defaults>
</compile_context>

<pallas_src>
import functools
import math

import jax
import jax.numpy as jnp
from jax.experimental import pallas as pl
from jax.experimental.pallas import tpu as pltpu


def make_fixed_embedding_table(c_in, d_model, dtype=jnp.float32):
    """Sinusoidal table identical to PyTorch FixedEmbedding.__init__."""
    assert d_model % 2 == 0, "FixedEmbedding requires an even d_model"
    position = jnp.arange(c_in, dtype=jnp.float32)[:, None]          # (c_in, 1)
    div_term = jnp.exp(
        jnp.arange(0, d_model, 2, dtype=jnp.float32)
        * -(math.log(10000.0) / d_model)
    )                                                                # (d_model//2,)
    w = jnp.zeros((c_in, d_model), jnp.float32)
    w = w.at[:, 0::2].set(jnp.sin(position * div_term))
    w = w.at[:, 1::2].set(jnp.cos(position * div_term))
    return w.astype(dtype)


def _gather_kernel(idx_ref, w_ref, o_ref):
    # idx_ref: (tile_t, 1) int32 in VMEM   — indices for this token tile
    # w_ref  : (c_in, d_model)             — full table, resident in VMEM
    # o_ref  : (tile_t, d_model)           — lane-dense output tile
    ids = idx_ref[...]                                          # (tile_t, 1)
    tile_t = ids.shape[0]
    c_in = w_ref.shape[0]
    # One-hot gather on the MXU: (tile_t, c_in) @ (c_in, d_model).
    # Out-of-range indices produce an all-zero row (no VMEM OOB read).
    iota = jax.lax.broadcasted_iota(jnp.int32, (tile_t, c_in), 1)
    onehot = (iota == ids).astype(w_ref.dtype)
    o_ref[...] = jnp.dot(
        onehot, w_ref[...], preferred_element_type=jnp.float32
    ).astype(o_ref.dtype)


def _round_up(x, m):
    return ((x + m - 1) // m) * m


def fixed_embedding(x, w, *, tile_t=256):
    """Equivalent of FixedEmbedding.forward: returns w[x] (w is fixed)."""
    c_in, d_model = w.shape
    orig_shape = x.shape
    idx = x.reshape(-1).astype(jnp.int32)
    n = idx.shape[0]

    # Adapt the tile: tiny inputs get a tile equal to their (8-aligned) length so
    # there is no padding and no post-kernel slice; large inputs use tile_t=256,
    # keeping multiple grid steps for v7x megacore sharding.
    tile_t = max(8, min(tile_t, _round_up(n, 8)))
    n_pad = _round_up(n, tile_t)
    if n_pad != n:
        idx = jnp.pad(idx, (0, n_pad - n))        # padded rows gather row 0, sliced off
    idx2d = idx.reshape(n_pad, 1)

    itemsize = jnp.dtype(w.dtype).itemsize
    table_bytes = c_in * d_model * itemsize
    out_tile_bytes = tile_t * d_model * itemsize
    idx_tile_bytes = _round_up(tile_t, 8) * 128 * 4   # padded layout upper bound
    # Resident table + double-buffered output + double-buffered idx tile.
    vmem_estimate = table_bytes + 2 * out_tile_bytes + 2 * idx_tile_bytes

    compiler_kwargs = dict(dimension_semantics=("parallel",))
    if vmem_estimate > 28 * 1024 * 1024:
        # Guard for v7x (64 MiB physical / 32 MiB default scoped): raise the
        # scoped limit rather than silently OOMing if c_in/d_model grow.
        compiler_kwargs["vmem_limit_bytes"] = min(
            int(vmem_estimate * 2), 60 * 1024 * 1024
        )

    cost = pl.CostEstimate(
        flops=2 * n_pad * c_in * d_model,
        transcendentals=0,
        bytes_accessed=n_pad * 4 + table_bytes + n_pad * d_model * itemsize,
    )

    out = pl.pallas_call(
        _gather_kernel,
        out_shape=jax.ShapeDtypeStruct((n_pad, d_model), w.dtype),
        grid=(n_pad // tile_t,),
        in_specs=[
            # Per-step index tile in VMEM.
            pl.BlockSpec((tile_t, 1), lambda i: (i, 0)),
            # Whole table as one block; constant index_map => stays resident in
            # VMEM across all grid steps (no per-step re-DMA).
            pl.BlockSpec((c_in, d_model), lambda i: (0, 0)),
        ],
        out_specs=pl.BlockSpec((tile_t, d_model), lambda i: (i, 0)),
        compiler_params=pltpu.CompilerParams(**compiler_kwargs),
        cost_estimate=cost,
    )(idx2d, w)

    if n_pad != n:
        out = out[:n]
    return out.reshape(*orig_shape, d_model)


def _reference_fixed_embedding(x, w):
    # Pure-JAX reference reproducing the PyTorch forward (embedding lookup).
    return jnp.take(w, x, axis=0)


if __name__ == "__main__":
    # Small shapes consistent with the module: batch=2, seq=16,
    # c_in=24 (e.g. hour-of-day vocabulary), d_model=128 (lane-dense).
    B, L = 2, 16
    C_IN, D_MODEL = 24, 128

    key = jax.random.PRNGKey(0)
    x = jax.random.randint(key, (B, L), 0, C_IN, dtype=jnp.int32)

    # TODO(synk): table construction is __init__ parameter setup (sin/cos init),
    # done once in plain JAX rather than inside the Pallas kernel.
    w = make_fixed_embedding_table(C_IN, D_MODEL)

    out = fixed_embedding(x, w)
    out = jax.block_until_ready(out)

    ref = _reference_fixed_embedding(x, w)
    assert out.shape == ref.shape == (B, L, D_MODEL), (out.shape, ref.shape)
    assert jnp.allclose(out, ref), "mismatch vs reference"

    print("KERNEL_OK")
</pallas_src>

<mosaic_0001>
module attributes {stable_mosaic.version = 11 : i64} {
  func.func @_gather_kernel(%arg0: i32, %arg1: memref<32x1xi32, #tpu.memory_space<vmem>>, %arg2: memref<24x128xf32, #tpu.memory_space<vmem>>, %arg3: memref<32x128xf32, #tpu.memory_space<vmem>>) attributes {dimension_semantics = [#tpu.dimension_semantics<parallel>], iteration_bounds = array<i64: 1>, scalar_prefetch = 0 : i64, scratch_operands = 0 : i64, tpu.core_type = #tpu.core_type<tc>, window_params = [{transform_indices = @transform_0, window_bounds = array<i64: 32, 1>}, {pipeline_mode = #tpu.pipeline_mode<synchronous>, transform_indices = @transform_1, window_bounds = array<i64: 24, 128>}, {transform_indices = @transform_2, window_bounds = array<i64: 32, 128>}]} {
    %c0 = arith.constant 0 : index
    %c0_0 = arith.constant 0 : index
    %0 = vector.load %arg1[%c0, %c0_0] : memref<32x1xi32, #tpu.memory_space<vmem>>, vector<32x1xi32>
    %1 = tpu.iota {dimensions = array<i32: 1>} : vector<32x24xi32>
    %2 = vector.broadcast %0 : vector<32x1xi32> to vector<32x24xi32>
    %3 = arith.cmpi eq, %1, %2 : vector<32x24xi32>
    %4 = arith.extui %3 : vector<32x24xi1> to vector<32x24xi32>
    %5 = arith.sitofp %4 : vector<32x24xi32> to vector<32x24xf32>
    %c0_1 = arith.constant 0 : index
    %c0_2 = arith.constant 0 : index
    %6 = vector.load %arg2[%c0_1, %c0_2] : memref<24x128xf32, #tpu.memory_space<vmem>>, vector<24x128xf32>
    %cst = arith.constant dense<0.000000e+00> : vector<32x128xf32>
    %7 = tpu.matmul %5, %6, %cst {dimension_numbers = #tpu.dot_dimension_numbers<[1], [0], [0], [1], [0, 0, 1, 1], [], []>} : vector<32x24xf32>, vector<24x128xf32>, vector<32x128xf32> -> vector<32x128xf32>
    %c0_3 = arith.constant 0 : index
    %c0_4 = arith.constant 0 : index
    %8 = vector.load %arg3[%c0_3, %c0_4] : memref<32x128xf32, #tpu.memory_space<vmem>>, vector<32x128xf32>
    tpu.vector_store %arg3[%c0_3, %c0_4], %7 {strides = array<i32>} : memref<32x128xf32, #tpu.memory_space<vmem>>, vector<32x128xf32>,
    return
  }
  func.func @transform_0(%arg0: i32) -> (i32, i32) {
    %c0_i32 = arith.constant 0 : i32
    %c0_i32_0 = arith.constant 0 : i32
    return %arg0, %c0_i32 : i32, i32
  }
  func.func @transform_1(%arg0: i32) -> (i32, i32) {
    %c0_i32 = arith.constant 0 : i32
    %c0_i32_0 = arith.constant 0 : i32
    %c0_i32_1 = arith.constant 0 : i32
    return %c0_i32, %c0_i32_0 : i32, i32
  }
  func.func @transform_2(%arg0: i32) -> (i32, i32) {
    %c0_i32 = arith.constant 0 : i32
    %c0_i32_0 = arith.constant 0 : i32
    return %arg0, %c0_i32 : i32, i32
  }
}

</mosaic_0001>

<bundles_post_ra>
// kernel: tpu_custom_call.1
= control target key start
LH: loop header
LB: loop body
LE: loop exit
PB: predicated region body
PF: predicated region fallthrough
CT: control target
= control target key end

     0   :  { %v229_v2 = vmov 0   ;;  %s282_s0 = inlined_call_operand.vmem [shape: s32[32,1], index: 0, kind: input, shape index: {}]   ;;  %s283_s1 = inlined_call_operand.vmem [shape: f32[24,128], index: 1, kind: input, shape index: {}]   ;;  %s284_s2 = inlined_call_operand.hbm [shape: f32[32,128], index: 2, kind: output, shape index: {}]  }
   0x1   :  { %v13_v0 = vld [vmem:[%s282_s0 + $0x8] sm:$0xff]  ;;  %v12_v1 = vld [vmem:[%s282_s0] sm:$0xff]  ;;  %204 = vset.pattern.permute.xlu1 %v229_v2  ;;  %203 = vset.pattern.permute.xlu0 %v229_v2 }
   0x2   :  { %v42_v3 = vld [vmem:[%s283_s1] sm:$0xff]  ;;  %v43_v4 = vld [vmem:[%s283_s1 + $0x8] sm:$0xff]  ;;  %22 = vperm.xlu1 %204, %v13_v0   ;;  %19 = vperm.xlu0 %203, %v12_v1  }
   0x3   :  { %v190_v5 = vpack.c.bf16 %v43_v4, %v42_v3 }
   0x4   :  { %7 = vsyncpa [#allocation3], 0  ;;  %v15_v6 = vld [vmem:[%s282_s0 + $0x18] sm:$0xff]  ;;  %v14_v7 = vld [vmem:[%s282_s0 + $0x10] sm:$0xff]  ;;  %v16_v9 = vlaneseq  ;;  %vm45_vm0 = vcmask 195584   ;;  %v230_v13 = vmov 0.0  }
   0x5   :  { %191 = vmatprep.subr.bf16.mxu0 %v190_v5  ;;  %194 = vmatprep.subr.bf16.mxu1 %v190_v5  ;;  %v44_v8 = vld [vmem:[%s283_s1 + $0x10] sm:$0xff]  ;;  %s231_s0 = smov [#allocation2]  }
   0x6   :  { %193 = vmatpush3.bf16.msra.mxu0 %v190_v5  ;;  %196 = vmatpush3.bf16.msra.mxu1 %v190_v5  ;;  %v17_v10 = vand.u32 127, %v16_v9  ;;  %s152_s1 = sshll.u32 %s231_s0, 4  ;;  %s153_s1 = int_to_ptr.vmem [resolvable:$true] %s152_s1 }
   0x7   :  { %28 = vperm.xlu1 %204, %v15_v6   ;;  %25 = vperm.xlu0 %203, %v14_v7   ;;  %s205_s23 = scalar_lea.vmem %s153_s1, 512  ;;  %p210_p1 = scmp.lt.s32.totalorder %s153_s1, %s153_s1 }
   0x8   :  { %182 = vmatprep.subr.mxu0 %v44_v8  ;;  %195 = vmatprep.subr.mxu1 %v44_v8  ;;  %p206_p0 = scmp.ne.s32.totalorder %s153_s1, %s205_s23  ;;  %p211_p2 = scmp.lt.s32.totalorder %s205_s23, %s205_s23 }
   0xa   :  { %183 = vmatpush3.msra.mxu0 %v44_v8  ;;  %197 = vmatpush3.msra.mxu1 %v44_v8  ;;  %p212_p3 = por %p211_p2, %p210_p1 }
   0xc   :  { %p213_p4 = pnand %p212_p3, %p206_p0 }
  0x81   :  { %v23_v11 = vpop.permute.xlu1 %22  ;;  %v20_v12 = vpop.permute.xlu0 %19 }
  0x82   :  { %vm31_vm1 = vcmp.eq.s32.totalorder %v17_v10, %v23_v11  ;;  %vm30_vm2 = vcmp.eq.s32.totalorder %v17_v10, %v20_v12 }
  0x83   :  { %v164_v14 = vsel %vm31_vm1, 1.0, %v230_v13  ;;  %v163_v15 = vsel %vm30_vm2, 1.0, %v230_v13 }
  0x84   :  { %184 = vmatprep.mubr.msk.f32.mxu0 %vm45_vm0, %v163_v15 }
  0x85   :  { %185 = vmatmul.mubr.msk.f32.vlgmr.msra.gmra.mrb[0].mxu0 %vm45_vm0, %v164_v14 }
  0x86   :  { %v29_v16 = vpop.permute.xlu1 %28  ;;  %v26_v17 = vpop.permute.xlu0 %25 }
  0x87   :  { %vm33_vm3 = vcmp.eq.s32.totalorder %v17_v10, %v29_v16  ;;  %vm32_vm4 = vcmp.eq.s32.totalorder %v17_v10, %v26_v17 }
  0x88   :  { %v166_v18 = vsel %vm33_vm3, 1.0, %v230_v13  ;;  %v165_v19 = vsel %vm32_vm4, 1.0, %v230_v13 }
  0x89   :  { %187 = vmatprep.mubr.msk.f32.mxu1 %vm45_vm0, %v165_v19 }
  0x8a   :  { %188 = vmatmul.mubr.msk.f32.vlgmr.msra.gmra.mrb[0].mxu1 %vm45_vm0, %v166_v18 }
 0x158   :  { %v186_v20 = vpop.f32.mrb[0].mxu0 }
 0x159   :  { %144 = vst [vmem:[#allocation2 + $0x8] sm:$0xff] %v186_v20  ;;  %v124_v21 = vpop.f32.mrb[1].mxu0 }
 0x15a   :  { %143 = vst [vmem:[#allocation2] sm:$0xff] %v124_v21 }
 0x15d   :  { %v189_v22 = vpop.f32.mrb[0].mxu1 }
 0x15e   :  { %146 = vst [vmem:[#allocation2 + $0x18] sm:$0xff] %v189_v22  ;;  %v134_v23 = vpop.f32.mrb[1].mxu1 }
 0x15f   :  { %145 = vst [vmem:[#allocation2 + $0x10] sm:$0xff] %v134_v23 }
 0x160   :  { %216 = shalt.err (!%p213_p4)
}
 0x161   :  { %s217_s26 = scalar_lea.hbm %s284_s2, 512 }
 0x162   :  { %p218_p5 = scmp.ne.s32.totalorder %s284_s2, %s217_s26  ;;  %p221_p6 = scmp.lt.u32.totalorder %s217_s26, %s284_s2 }
 0x164   :  { %p223_p7 = pnand %p221_p6, %p218_p5 }
 0x166   :  { %226 = shalt.err (!%p223_p7)
}
 0x167   :  { %s232_s3 = smov 128   ;;  %s233_s4 = smov 8  }
 0x168   :  { %158 = dma.vmem_to_hbm [thread:$0]  %s153_s1, 512, %s284_s2, [#allocation3], %s232_s3, %s232_s3, %s233_s4  }
 0x169   :  { %227 = dma.done.wait [#allocation3], 512  }
 0x16a   :  { %228 = vsyncadd [#allocation3], 4294966784 }
 0x16b   :  { %162 = vsyncpa [#allocation3], 1 }

</bundles_post_ra>
